<compile_context>
chip_gen: v7x
topology: tpu7x:2x2x1
jax: 0.10.0
libtpu: 0.0.40
codegen_flags: <defaults>
</compile_context>

<pallas_src>
import functools

import jax
import jax.numpy as jnp
from jax.experimental import pallas as pl
from jax.experimental.pallas import tpu as pltpu


def _normalize_kernel(x_ref, mean_ref, scale_ref, o_ref, *, tr, resident, nrt):
    """o = (x - mean) * scale, computed in f32, cast to the output dtype."""
    if resident and nrt > 1:
        # mean_ref / scale_ref hold the whole (row-padded) per-row constant
        # arrays resident in VMEM; slice out this row-tile's window.
        start = pl.multiple_of(pl.program_id(0) * tr, 8)
        mean = mean_ref[pl.ds(start, tr), :]
        scale = scale_ref[pl.ds(start, tr), :]
    else:
        # Either a (tr, 1) block was delivered for us, or there is a single
        # row tile and the resident array is exactly (tr, 1).
        mean = mean_ref[...]
        scale = scale_ref[...]
    x = x_ref[...].astype(jnp.float32)
    o_ref[...] = ((x - mean) * scale).astype(o_ref.dtype)


def _pick_tiles(R, L, itemsize, target_bytes):
    """Tile sizes for an (R, L) array where L is a multiple of 128.

    Lane tile: multiple of 128 (or full L).  Row tile: multiple of the
    dtype's packed-sublane factor (8 f32 / 16 bf16 / 32 int8) or full R.
    Targets ~target_bytes per tile so in+out, double-buffered (~4x tile),
    stays under the scoped-VMEM limit while amortizing per-step overhead.
    """
    row_align = 8 * max(1, 4 // max(1, itemsize))

    # Lane tile sized so a row_align-row strip is roughly target_bytes.
    max_lanes = max(128, (target_bytes // (row_align * itemsize)) // 128 * 128)
    tl = min(L, max_lanes)

    rows = max(1, target_bytes // (tl * itemsize))
    if rows >= R:
        tr = R  # full row extent (legal even if not a multiple of row_align)
    else:
        tr = max(row_align, (rows // row_align) * row_align)

    # If the whole array fits in one tile, split the row axis in two so a
    # two-TensorCore chip (v7x) can shard the 'parallel' grid.
    if tr >= R and tl >= L and R >= 2 * row_align:
        half = -(-R // 2)
        tr = row_align * (-(-half // row_align))

    return tr, tl, row_align


def normalize(x: jax.Array, mean: jax.Array, std: jax.Array,
              *, target_bytes: int = 6 * 1024 * 1024) -> jax.Array:
    """x: [N, C, H, W]; mean, std: [C].  Returns (x - mean) / std per channel."""
    N, C, H, W = x.shape
    R, L = N * C, H * W

    xf = x.reshape(R, L)

    # Pad the lane dim up to a multiple of 128: unmasked lane-dense stores,
    # and the lane tile can be chosen freely (bounded VMEM) for odd H*W.
    L_pad = ((L + 127) // 128) * 128
    if L_pad != L:
        xf = jnp.pad(xf, ((0, 0), (0, L_pad - L)))

    itemsize = jnp.dtype(x.dtype).itemsize
    tr, tl, _ = _pick_tiles(R, L_pad, itemsize, target_bytes)
    grid_r, grid_l = pl.cdiv(R, tr), pl.cdiv(L_pad, tl)

    # Per-row constants in float32 (no divide in the hot loop); padded to a
    # whole number of row tiles so in-kernel slices never go out of bounds.
    mean_rows = jnp.tile(mean.astype(jnp.float32), N).reshape(R, 1)
    scale_rows = jnp.tile(1.0 / std.astype(jnp.float32), N).reshape(R, 1)
    R_pad = grid_r * tr
    if R_pad != R:
        mean_rows = jnp.pad(mean_rows, ((0, R_pad - R), (0, 0)))
        scale_rows = jnp.pad(scale_rows, ((0, R_pad - R), (0, 0)),
                             constant_values=1.0)

    # Keep the per-row constants fully resident in VMEM when small (an (r,1)
    # f32 array occupies ~512 B/row once lane-padded); otherwise fall back to
    # per-row-tile (tr, 1) blocks.
    resident_bytes = ((R_pad + 7) // 8) * 8 * 128 * 4
    resident = resident_bytes <= (1 << 20)
    if resident:
        const_spec = pl.BlockSpec(memory_space=pltpu.MemorySpace.VMEM)
    else:
        const_spec = pl.BlockSpec((tr, 1), lambda i, j: (i, 0))

    kernel = functools.partial(
        _normalize_kernel, tr=tr, resident=resident, nrt=grid_r)

    out = pl.pallas_call(
        kernel,
        out_shape=jax.ShapeDtypeStruct((R, L_pad), x.dtype),
        grid=(grid_r, grid_l),
        in_specs=[
            pl.BlockSpec((tr, tl), lambda i, j: (i, j)),  # x tile
            const_spec,                                   # per-row mean (f32)
            const_spec,                                   # per-row 1/std (f32)
        ],
        out_specs=pl.BlockSpec((tr, tl), lambda i, j: (i, j)),
        compiler_params=pltpu.CompilerParams(
            dimension_semantics=("parallel", "parallel"),
            vmem_limit_bytes=32 * 1024 * 1024,
        ),
    )(xf, mean_rows, scale_rows)

    if L_pad != L:
        out = out[:, :L]
    return out.reshape(N, C, H, W)


if __name__ == "__main__":
    key = jax.random.PRNGKey(0)

    # Deterministic per-channel normalization constants (as the module's
    # __init__ would receive as python lists).
    mean = jnp.array([0.485, 0.456, 0.406, 0.5], dtype=jnp.float32)
    std = jnp.array([0.229, 0.224, 0.225, 0.25], dtype=jnp.float32)

    # Main case: lane dim (H*W = 256) already a multiple of 128.
    N, C, H, W = 2, 4, 16, 16
    x = jax.random.normal(key, (N, C, H, W), dtype=jnp.float32)
    y = jax.block_until_ready(normalize(x, mean, std))
    y_ref = (x - mean.reshape(1, C, 1, 1)) / std.reshape(1, C, 1, 1)
    assert y.shape == (N, C, H, W)
    assert jnp.allclose(y, y_ref, rtol=1e-6, atol=1e-6)

    # Odd spatial size (7x7 = 49 lanes) exercises the pad-and-slice path.
    x2 = jax.random.normal(jax.random.PRNGKey(1), (2, 4, 7, 7), dtype=jnp.float32)
    y2 = jax.block_until_ready(normalize(x2, mean, std))
    y2_ref = (x2 - mean.reshape(1, 4, 1, 1)) / std.reshape(1, 4, 1, 1)
    assert jnp.allclose(y2, y2_ref, rtol=1e-6, atol=1e-6)

    print("KERNEL_OK")
</pallas_src>

<mosaic_0001>
module attributes {stable_mosaic.version = 11 : i64} {
  func.func @_normalize_kernel(%arg0: i32, %arg1: i32, %arg2: memref<8x256xf32, #tpu.memory_space<vmem>>, %arg3: memref<8x1xf32, #tpu.memory_space<vmem>>, %arg4: memref<8x1xf32, #tpu.memory_space<vmem>>, %arg5: memref<8x256xf32, #tpu.memory_space<vmem>>) attributes {dimension_semantics = [#tpu.dimension_semantics<parallel>, #tpu.dimension_semantics<parallel>], iteration_bounds = array<i64: 1, 1>, scalar_prefetch = 0 : i64, scratch_operands = 0 : i64, tpu.core_type = #tpu.core_type<tc>, window_params = [{transform_indices = @transform_0, window_bounds = array<i64: 8, 256>}, {pipeline_mode = #tpu.pipeline_mode<synchronous>, transform_indices = @transform_1, window_bounds = array<i64: 8, 1>}, {pipeline_mode = #tpu.pipeline_mode<synchronous>, transform_indices = @transform_2, window_bounds = array<i64: 8, 1>}, {transform_indices = @transform_3, window_bounds = array<i64: 8, 256>}]} {
    %c0 = arith.constant 0 : index
    %c0_0 = arith.constant 0 : index
    %0 = vector.load %arg3[%c0, %c0_0] : memref<8x1xf32, #tpu.memory_space<vmem>>, vector<8x1xf32>
    %c0_1 = arith.constant 0 : index
    %c0_2 = arith.constant 0 : index
    %1 = vector.load %arg4[%c0_1, %c0_2] : memref<8x1xf32, #tpu.memory_space<vmem>>, vector<8x1xf32>
    %c0_3 = arith.constant 0 : index
    %c0_4 = arith.constant 0 : index
    %2 = vector.load %arg2[%c0_3, %c0_4] : memref<8x256xf32, #tpu.memory_space<vmem>>, vector<8x256xf32>
    %3 = vector.broadcast %0 : vector<8x1xf32> to vector<8x256xf32>
    %4 = arith.subf %2, %3 : vector<8x256xf32>
    %5 = vector.broadcast %1 : vector<8x1xf32> to vector<8x256xf32>
    %6 = arith.mulf %4, %5 : vector<8x256xf32>
    %c0_5 = arith.constant 0 : index
    %c0_6 = arith.constant 0 : index
    %7 = vector.load %arg5[%c0_5, %c0_6] : memref<8x256xf32, #tpu.memory_space<vmem>>, vector<8x256xf32>
    tpu.vector_store %arg5[%c0_5, %c0_6], %6 {strides = array<i32>} : memref<8x256xf32, #tpu.memory_space<vmem>>, vector<8x256xf32>,
    return
  }
  func.func @transform_0(%arg0: i32, %arg1: i32) -> (i32, i32) {
    %c0_i32 = arith.constant 0 : i32
    return %arg0, %arg1 : i32, i32
  }
  func.func @transform_1(%arg0: i32, %arg1: i32) -> (i32, i32) {
    %c0_i32 = arith.constant 0 : i32
    %c0_i32_0 = arith.constant 0 : i32
    %c0_i32_1 = arith.constant 0 : i32
    return %c0_i32, %c0_i32_0 : i32, i32
  }
  func.func @transform_2(%arg0: i32, %arg1: i32) -> (i32, i32) {
    %c0_i32 = arith.constant 0 : i32
    %c0_i32_0 = arith.constant 0 : i32
    %c0_i32_1 = arith.constant 0 : i32
    return %c0_i32, %c0_i32_0 : i32, i32
  }
  func.func @transform_3(%arg0: i32, %arg1: i32) -> (i32, i32) {
    %c0_i32 = arith.constant 0 : i32
    return %arg0, %arg1 : i32, i32
  }
}

</mosaic_0001>

<bundles_post_ra>
// kernel: tpu_custom_call.1
= control target key start
LH: loop header
LB: loop body
LE: loop exit
PB: predicated region body
PF: predicated region fallthrough
CT: control target
= control target key end

     0   :  { %v76_v1 = vmov 0   ;;  %s122_s0 = inlined_call_operand.vmem [shape: f32[8,256], index: 0, kind: input, shape index: {}]   ;;  %s123_s1 = inlined_call_operand.vmem [shape: f32[8,1], index: 1, kind: input, shape index: {}]   ;;  %s124_s2 = inlined_call_operand.vmem [shape: f32[8,1], index: 2, kind: input, shape index: {}]   ;;  %s125_s3 = inlined_call_operand.hbm [shape: f32[8,256], index: 3, kind: output, shape index: {}]  }
   0x1   :  { %v15_v0 = vld [vmem:[%s123_s1] sm:$0xff]  ;;  %51 = vset.pattern.permute.xlu0 %v76_v1 }
   0x2   :  { %8 = vsyncpa [#allocation3], 0  ;;  %21 = vperm.xlu0 %51, %v15_v0   ;;  %v16_v2 = vld [vmem:[%s124_s2] sm:$0xff]  ;;  %v18_v4 = vld [vmem:[%s122_s0 + $0x8] sm:$0xff]  ;;  %s77_s20 = smov [#allocation2]  }
   0x3   :  { %v17_v3 = vld [vmem:[%s122_s0] sm:$0xff]  ;;  %s41_s1 = sshll.u32 %s77_s20, 4  ;;  %s42_s1 = int_to_ptr.vmem [resolvable:$true] %s41_s1 }
   0x4   :  { %s52_s2 = scalar_lea.vmem %s42_s1, 256  ;;  %p57_p1 = scmp.lt.s32.totalorder %s42_s1, %s42_s1 }
   0x5   :  { %p53_p0 = scmp.ne.s32.totalorder %s42_s1, %s52_s2  ;;  %p58_p2 = scmp.lt.s32.totalorder %s52_s2, %s52_s2 }
   0x6   :  { %28 = vperm.xlu0 %51, %v16_v2  }
   0x7   :  { %p59_p3 = por %p58_p2, %p57_p1 }
   0x9   :  { %p60_p4 = pnand %p59_p3, %p53_p0 }
  0x81   :  { %v22_v5 = vpop.permute.xlu0 %21 }
  0x82   :  { %v24_v6 = vsub.f32 %v17_v3, %v22_v5  ;;  %v25_v7 = vsub.f32 %v18_v4, %v22_v5 }
  0x85   :  { %v29_v8 = vpop.permute.xlu0 %28 }
  0x86   :  { %v31_v9 = vmul.f32 %v29_v8, %v24_v6  ;;  %v32_v10 = vmul.f32 %v29_v8, %v25_v7 }
  0x88   :  { %33 = vst [vmem:[#allocation2] sm:$0xff] %v31_v9  ;;  %34 = vst [vmem:[#allocation2 + $0x8] sm:$0xff] %v32_v10 }
  0x89   :  { %63 = shalt.err (!%p60_p4)
}
  0x8a   :  { %s64_s22 = scalar_lea.hbm %s125_s3, 256 }
  0x8b   :  { %p65_p5 = scmp.ne.s32.totalorder %s125_s3, %s64_s22  ;;  %p68_p6 = scmp.lt.u32.totalorder %s64_s22, %s125_s3 }
  0x8d   :  { %p70_p7 = pnand %p68_p6, %p65_p5 }
  0x8f   :  { %73 = shalt.err (!%p70_p7)
}
  0x90   :  { %44 = dma.vmem_to_hbm [thread:$0]  %s42_s1, 256, %s125_s3, [#allocation3]  }
  0x91   :  { %74 = dma.done.wait [#allocation3], 256  }
  0x92   :  { %75 = vsyncadd [#allocation3], 4294967040 }
  0x93   :  { %48 = vsyncpa [#allocation3], 1 }

</bundles_post_ra>
